<compile_context>
chip_gen: v5e
topology: v5e:2x2
jax: 0.10.0
libtpu: 0.0.40
codegen_flags: <defaults>
</compile_context>

<pallas_src>
import math
from functools import partial

import jax
import jax.numpy as jnp
from jax.experimental import pallas as pl
from jax.experimental.pallas import tpu as pltpu

_LANE = 128


def _gru_gate_kernel(wu_ref, xh_ref, b_ref, o_ref, *, activation):
    # One fused MXU matmul: (rows, 2*rows) @ (2*rows, col_tile), f32 accumulate.
    pre = jnp.dot(wu_ref[...], xh_ref[...], preferred_element_type=jnp.float32)
    pre = pre + b_ref[...]  # bias already f32
    if activation == "sigmoid":
        act = jax.nn.sigmoid(pre)
    elif activation == "tanh":
        act = jnp.tanh(pre)
    else:
        act = pre  # identity
    o_ref[...] = act.astype(o_ref.dtype)


def _round_up(n, m):
    return ((n + m - 1) // m) * m


@partial(jax.jit, static_argnames=("activation",))
def mat_gru_gate(W, U, bias, x, hidden, activation="sigmoid"):
    rows, cols = bias.shape
    assert W.shape == (rows, rows) and U.shape == (rows, rows)
    assert x.shape == (rows, cols) and hidden.shape == (rows, cols)
    out_dtype = x.dtype

    # ---- wrapper-side layout plumbing (casts / concat / zero padding only) ----
    # Fuse W@x + U@h into a single matmul [W | U] @ [x ; h]; bf16 operands.
    WU = jnp.concatenate([W, U], axis=1).astype(jnp.bfloat16)       # (rows, 2*rows)
    XH = jnp.concatenate([x, hidden], axis=0).astype(jnp.bfloat16)  # (2*rows, cols)

    # Lane-dense cols: pad to a multiple of 128; pick the largest 128-multiple
    # tile (<= 512) that divides the padded width.
    cols_p = _round_up(cols, _LANE)
    col_tile = _LANE
    for cand in (512, 256, 128):
        if cols_p % cand == 0:
            col_tile = cand
            break
    pad_c = cols_p - cols
    if pad_c:
        XH = jnp.pad(XH, ((0, 0), (0, pad_c)))
        bias_p = jnp.pad(bias, ((0, 0), (0, pad_c)))
    else:
        bias_p = bias
    bias_p = bias_p.astype(jnp.float32)

    grid = (cols_p // col_tile,)

    out = pl.pallas_call(
        partial(_gru_gate_kernel, activation=activation),
        out_shape=jax.ShapeDtypeStruct((rows, cols_p), out_dtype),
        grid=grid,
        in_specs=[
            # fused weights: VMEM-resident, constant across the cols grid axis
            pl.BlockSpec((rows, 2 * rows), lambda j: (0, 0)),
            # activations / bias: tiled + double-buffered along cols
            pl.BlockSpec((2 * rows, col_tile), lambda j: (0, j)),
            pl.BlockSpec((rows, col_tile), lambda j: (0, j)),
        ],
        out_specs=pl.BlockSpec((rows, col_tile), lambda j: (0, j)),
        compiler_params=pltpu.CompilerParams(
            dimension_semantics=("parallel",),  # shard col tiles across TCs on v7x
        ),
    )(WU, XH, bias_p)

    return out[:, :cols]


def _init_params(key, rows, cols, dtype=jnp.float32):
    # Mirrors reset_param: uniform(-stdv, stdv), stdv = 1/sqrt(rows); bias = 0.
    kw, ku = jax.random.split(key)
    stdv = 1.0 / math.sqrt(rows)
    W = jax.random.uniform(kw, (rows, rows), dtype, minval=-stdv, maxval=stdv)
    U = jax.random.uniform(ku, (rows, rows), dtype, minval=-stdv, maxval=stdv)
    bias = jnp.zeros((rows, cols), dtype)
    return W, U, bias


if __name__ == "__main__":
    rows, cols = 32, 16  # small shapes consistent with the module
    key = jax.random.PRNGKey(0)
    kp, kx, kh = jax.random.split(key, 3)

    W, U, bias = _init_params(kp, rows, cols)
    x = jax.random.normal(kx, (rows, cols), jnp.float32)
    hidden = jax.random.normal(kh, (rows, cols), jnp.float32)

    out_sig = jax.block_until_ready(mat_gru_gate(W, U, bias, x, hidden, "sigmoid"))
    out_tanh = jax.block_until_ready(mat_gru_gate(W, U, bias, x, hidden, "tanh"))
    assert out_sig.shape == (rows, cols) and out_tanh.shape == (rows, cols)

    # Reference mirroring the kernel's math (bf16 operands, f32 accumulate).
    Wb, Ub = W.astype(jnp.bfloat16), U.astype(jnp.bfloat16)
    xb, hb = x.astype(jnp.bfloat16), hidden.astype(jnp.bfloat16)
    pre_bf16 = (
        jnp.dot(Wb, xb, preferred_element_type=jnp.float32)
        + jnp.dot(Ub, hb, preferred_element_type=jnp.float32)
        + bias
    )
    assert jnp.allclose(out_sig, jax.nn.sigmoid(pre_bf16), atol=2e-3, rtol=2e-3)
    assert jnp.allclose(out_tanh, jnp.tanh(pre_bf16), atol=2e-3, rtol=2e-3)

    # Sanity vs. the exact f32 PyTorch math (only bf16 input quantization differs).
    pre_f32 = W @ x + U @ hidden + bias
    assert jnp.allclose(out_sig, jax.nn.sigmoid(pre_f32), atol=5e-2, rtol=5e-2)
    assert jnp.allclose(out_tanh, jnp.tanh(pre_f32), atol=5e-2, rtol=5e-2)

    print("KERNEL_OK")
</pallas_src>

<mosaic_0001>
module attributes {stable_mosaic.version = 11 : i64} {
  func.func @_gru_gate_kernel(%arg0: i32, %arg1: memref<32x64xbf16, #tpu.memory_space<vmem>>, %arg2: memref<64x128xbf16, #tpu.memory_space<vmem>>, %arg3: memref<32x128xf32, #tpu.memory_space<vmem>>, %arg4: memref<32x128xf32, #tpu.memory_space<vmem>>) attributes {dimension_semantics = [#tpu.dimension_semantics<parallel>], iteration_bounds = array<i64: 1>, scalar_prefetch = 0 : i64, scratch_operands = 0 : i64, tpu.core_type = #tpu.core_type<tc>, window_params = [{pipeline_mode = #tpu.pipeline_mode<synchronous>, transform_indices = @transform_0, window_bounds = array<i64: 32, 64>}, {transform_indices = @transform_1, window_bounds = array<i64: 64, 128>}, {transform_indices = @transform_2, window_bounds = array<i64: 32, 128>}, {transform_indices = @transform_3, window_bounds = array<i64: 32, 128>}]} {
    %c0 = arith.constant 0 : index
    %c0_0 = arith.constant 0 : index
    %0 = vector.load %arg1[%c0, %c0_0] : memref<32x64xbf16, #tpu.memory_space<vmem>>, vector<32x64xbf16>
    %c0_1 = arith.constant 0 : index
    %c0_2 = arith.constant 0 : index
    %1 = vector.load %arg2[%c0_1, %c0_2] : memref<64x128xbf16, #tpu.memory_space<vmem>>, vector<64x128xbf16>
    %cst = arith.constant dense<0.000000e+00> : vector<32x128xf32>
    %2 = tpu.matmul %0, %1, %cst {dimension_numbers = #tpu.dot_dimension_numbers<[1], [0], [0], [1], [0, 0, 1, 1], [], []>} : vector<32x64xbf16>, vector<64x128xbf16>, vector<32x128xf32> -> vector<32x128xf32>
    %c0_3 = arith.constant 0 : index
    %c0_4 = arith.constant 0 : index
    %3 = vector.load %arg3[%c0_3, %c0_4] : memref<32x128xf32, #tpu.memory_space<vmem>>, vector<32x128xf32>
    %4 = arith.addf %2, %3 : vector<32x128xf32>
    %5 = arith.negf %4 : vector<32x128xf32>
    %6 = math.exp %5 : vector<32x128xf32>
    %cst_5 = arith.constant 1.000000e+00 : f32
    %7 = vector.broadcast %cst_5 : f32 to vector<32x128xf32>
    %8 = arith.addf %7, %6 : vector<32x128xf32>
    %9 = arith.divf %7, %8 : vector<32x128xf32>
    %c0_6 = arith.constant 0 : index
    %c0_7 = arith.constant 0 : index
    %10 = vector.load %arg4[%c0_6, %c0_7] : memref<32x128xf32, #tpu.memory_space<vmem>>, vector<32x128xf32>
    tpu.vector_store %arg4[%c0_6, %c0_7], %9 {strides = array<i32>} : memref<32x128xf32, #tpu.memory_space<vmem>>, vector<32x128xf32>,
    return
  }
  func.func @transform_0(%arg0: i32) -> (i32, i32) {
    %c0_i32 = arith.constant 0 : i32
    %c0_i32_0 = arith.constant 0 : i32
    %c0_i32_1 = arith.constant 0 : i32
    return %c0_i32, %c0_i32_0 : i32, i32
  }
  func.func @transform_1(%arg0: i32) -> (i32, i32) {
    %c0_i32 = arith.constant 0 : i32
    %c0_i32_0 = arith.constant 0 : i32
    return %c0_i32, %arg0 : i32, i32
  }
  func.func @transform_2(%arg0: i32) -> (i32, i32) {
    %c0_i32 = arith.constant 0 : i32
    %c0_i32_0 = arith.constant 0 : i32
    return %c0_i32, %arg0 : i32, i32
  }
  func.func @transform_3(%arg0: i32) -> (i32, i32) {
    %c0_i32 = arith.constant 0 : i32
    %c0_i32_0 = arith.constant 0 : i32
    return %c0_i32, %arg0 : i32, i32
  }
}

</mosaic_0001>

<bundles_post_ra>
// kernel: mat_gru_gate.1
= control target key start
LH: loop header
LB: loop body
LE: loop exit
PB: predicated region body
PF: predicated region fallthrough
CT: control target
= control target key end

     0   :  { %vm65_vm0 = vcmask 523264   ;;  %s293_s1 = inlined_call_operand.vmem [shape: bf16[64,128], index: 1, kind: input, shape index: {}]   ;;  %s294_s0 = inlined_call_operand.vmem [shape: bf16[32,64], index: 0, kind: input, shape index: {}]   ;;  %s295_s2 = inlined_call_operand.vmem [shape: f32[32,128], index: 2, kind: input, shape index: {}]   ;;  %s296_s3 = inlined_call_operand.vmem [shape: f32[32,128], index: 3, kind: output, shape index: {}]  }
   0x1   :  { %v210_v0 = vld [vmem:[%s293_s1 + $0x18] sm:$0xff]  ;;  %v209_v1 = vld [vmem:[%s293_s1 + $0x10] sm:$0xff]  ;;  %v208_v2 = vld [vmem:[%s293_s1 + $0x8] sm:$0xff] }
   0x2   :  { %76 = vmatpush.bf16.msra.mxu0 %v210_v0  ;;  %211 = vmatpush.bf16.msra.mxu1 %v210_v0  ;;  %v207_v3 = vld [vmem:[%s293_s1] sm:$0xff]  ;;  %v206_v5 = vld [vmem:[%s294_s0 + $0x8] sm:$0xff]  ;;  %v29_v7 = vld [vmem:[%s295_s2 + $0x10] sm:$0xff] }
   0x3   :  { %v205_v4 = vld [vmem:[%s294_s0] sm:$0xff]  ;;  %v28_v14 = vld [vmem:[%s295_s2 + $0x8] sm:$0xff]  ;;  %v30_v15 = vld [vmem:[%s295_s2 + $0x18] sm:$0xff] }
   0x4   :  { %v27_v6 = vld [vmem:[%s295_s2] sm:$0xff] }
   0x6   :  { %77 = vmatpush.bf16.msra.mxu0 %v209_v1  ;;  %212 = vmatpush.bf16.msra.mxu1 %v209_v1 }
   0xa   :  { %78 = vmatpush.bf16.msra.mxu0 %v208_v2  ;;  %213 = vmatpush.bf16.msra.mxu1 %v208_v2 }
   0xe   :  { %79 = vmatpush.bf16.msra.mxu0 %v207_v3  ;;  %214 = vmatpush.bf16.msra.mxu1 %v207_v3 }
  0x11   :  { %199 = vmatmul.msk.bf16.vlgmr.msra.gmra.mxu0 %vm65_vm0, %v205_v4  ;;  %200 = vmatmul.msk.bf16.vlgmr.msra.gmra.mxu1 %vm65_vm0, %v206_v5 }
  0x8e   :  { %v81_v8 = vpop.f32.mrf.mxu0  ;;  %v86_v9 = vpop.f32.mrf.mxu1 }
  0x8f   :  { %v82_v10 = vadd.f32 %v81_v8, %v27_v6  ;;  %v87_v11 = vadd.f32 %v86_v9, %v29_v7 }
  0x91   :  { %v201_v12 = vmul.f32 -1.442695, %v82_v10  ;;  %v203_v13 = vmul.f32 -1.442695, %v87_v11 }
  0x93   :  { %215 = vpow2.f32 %v201_v12 }
  0x94   :  { %217 = vpow2.f32 %v203_v13 }
  0x96   :  { %v83_v16 = vpop.f32.mrf.mxu0  ;;  %v88_v17 = vpop.f32.mrf.mxu1 }
  0x97   :  { %v84_v18 = vadd.f32 %v83_v16, %v28_v14  ;;  %v89_v19 = vadd.f32 %v88_v17, %v30_v15 }
  0x99   :  { %v216_v20 = vpop.eup %215  ;;  %v202_v21 = vmul.f32 -1.442695, %v84_v18  ;;  %v204_v24 = vmul.f32 -1.442695, %v89_v19 }
  0x9a   :  { %v218_v22 = vpop.eup %217  ;;  %v103_v23 = vadd.f32 1.0, %v216_v20 }
  0x9b   :  { %v105_v25 = vadd.f32 1.0, %v218_v22  ;;  %219 = vpow2.f32 %v202_v21 }
  0x9c   :  { %221 = vrcp.f32 %v103_v23  ;;  %v116_v35 = vand.u32 2147483647, %v103_v23  ;;  %v118_v36 = vand.u32 2147483648, %v103_v23  ;;  %vm112_vm3 = vweird.f32 %v103_v23 }
  0x9d   :  { %223 = vrcp.f32 %v105_v25  ;;  %v148_v39 = vand.u32 2147483648, %v105_v25  ;;  %v146_v41 = vand.u32 2147483647, %v105_v25  ;;  %vm142_vm5 = vweird.f32 %v105_v25 }
  0x9e   :  { %225 = vpow2.f32 %v204_v24  ;;  %v119_v44 = vor.u32 1.1754944e-38, %v118_v36  ;;  %vm117_vm6 = vcmp.eq.f32.partialorder %v116_v35, 8.507059e+37 }
  0x9f   :  { %v149_v47 = vor.u32 1.1754944e-38, %v148_v39  ;;  %vm147_vm8 = vcmp.eq.f32.partialorder %v146_v41, 8.507059e+37 }
  0xa1   :  { %v220_v26 = vpop.eup %219 }
  0xa2   :  { %v222_v27 = vpop.eup %221  ;;  %v104_v28 = vadd.f32 1.0, %v220_v26 }
  0xa3   :  { %v224_v29 = vpop.eup %223  ;;  %v108_v30 = vmul.f32 %v222_v27, %v103_v23  ;;  %vm113_vm1 = vweird.f32 %v222_v27 }
  0xa4   :  { %v226_v31 = vpop.eup %225  ;;  %v138_v32 = vmul.f32 %v224_v29, %v105_v25  ;;  %227 = vrcp.f32 %v104_v28  ;;  %vm143_vm2 = vweird.f32 %v224_v29  ;;  %vm114_vm4 = vmor %vm112_vm3, %vm113_vm1  ;;  %v133_v54 = vand.u32 2147483648, %v104_v28 }
  0xa5   :  { %v109_v33 = vsub.f32 1.0, %v108_v30  ;;  %v106_v34 = vadd.f32 1.0, %v226_v31  ;;  %vm144_vm7 = vmor %vm142_vm5, %vm143_vm2  ;;  %v131_v57 = vand.u32 2147483647, %v104_v28  ;;  %vm127_vm10 = vweird.f32 %v104_v28 }
  0xa6   :  { %v139_v37 = vsub.f32 1.0, %v138_v32  ;;  %v134_v61 = vor.u32 1.1754944e-38, %v133_v54 }
  0xa7   :  { %v110_v38 = vmul.f32 %v222_v27, %v109_v33  ;;  %229 = vrcp.f32 %v106_v34  ;;  %v163_v60 = vand.u32 2147483648, %v106_v34  ;;  %v161_v63 = vand.u32 2147483647, %v106_v34 }
  0xa8   :  { %v140_v40 = vmul.f32 %v224_v29, %v139_v37  ;;  %vm132_vm13 = vcmp.eq.f32.partialorder %v131_v57, 8.507059e+37  ;;  %vm157_vm14 = vweird.f32 %v106_v34 }
  0xa9   :  { %v111_v42 = vadd.f32 %v222_v27, %v110_v38  ;;  %v164_v3 = vor.u32 1.1754944e-38, %v163_v60  ;;  %vm162_vm0 = vcmp.eq.f32.partialorder %v161_v63, 8.507059e+37 }
  0xaa   :  { %v228_v43 = vpop.eup %227  ;;  %v141_v45 = vadd.f32 %v224_v29, %v140_v40 }
  0xab   :  { %v115_v46 = vsel %vm114_vm4, %v222_v27, %v111_v42  ;;  %v123_v48 = vmul.f32 %v228_v43, %v104_v28  ;;  %vm128_vm9 = vweird.f32 %v228_v43 }
  0xac   :  { %v120_v49 = vsel %vm117_vm6, %v119_v44, %v115_v46  ;;  %v145_v50 = vsel %vm144_vm7, %v224_v29, %v141_v45  ;;  %vm129_vm11 = vmor %vm127_vm10, %vm128_vm9 }
  0xad   :  { %v230_v51 = vpop.eup %229  ;;  %167 = vst [vmem:[%s296_s3] sm:$0xff] %v120_v49  ;;  %v150_v52 = vsel %vm147_vm8, %v149_v47, %v145_v50  ;;  %v124_v53 = vsub.f32 1.0, %v123_v48 }
  0xae   :  { %169 = vst [vmem:[%s296_s3 + $0x10] sm:$0xff] %v150_v52  ;;  %v153_v55 = vmul.f32 %v230_v51, %v106_v34  ;;  %vm158_vm12 = vweird.f32 %v230_v51 }
  0xaf   :  { %v125_v56 = vmul.f32 %v228_v43, %v124_v53  ;;  %vm159_vm15 = vmor %vm157_vm14, %vm158_vm12 }
  0xb0   :  { %v154_v58 = vsub.f32 1.0, %v153_v55 }
  0xb1   :  { %v126_v59 = vadd.f32 %v228_v43, %v125_v56 }
  0xb2   :  { %v155_v62 = vmul.f32 %v230_v51, %v154_v58 }
  0xb3   :  { %v130_v0 = vsel %vm129_vm11, %v228_v43, %v126_v59 }
  0xb4   :  { %v135_v1 = vsel %vm132_vm13, %v134_v61, %v130_v0  ;;  %v156_v2 = vadd.f32 %v230_v51, %v155_v62 }
  0xb5   :  { %168 = vst [vmem:[%s296_s3 + $0x8] sm:$0xff] %v135_v1 }
  0xb6   :  { %v160_v4 = vsel %vm159_vm15, %v230_v51, %v156_v2 }
  0xb7   :  { %v165_v5 = vsel %vm162_vm0, %v164_v3, %v160_v4 }
  0xb8   :  { %170 = vst [vmem:[%s296_s3 + $0x18] sm:$0xff] %v165_v5 }

</bundles_post_ra>
